<compile_context>
chip_gen: v7x
topology: tpu7x:2x2x1
jax: 0.10.0
libtpu: 0.0.40
codegen_flags: <defaults>
</compile_context>

<pallas_src>
import functools

import jax
import jax.numpy as jnp
from jax.experimental import pallas as pl
from jax.experimental.pallas import tpu as pltpu

_LANE = 128
_TILE_BYTES = 4 * 1024 * 1024        # ~4 MiB per pipeline buffer (byte-based cap)
_VMEM_LIMIT = 32 * 1024 * 1024       # explicit scoped-VMEM cap: safe on v5e/v6e/v7x


def _sublane_multiple(*dtypes) -> int:
    # 8 (>=4B dtypes), 16 (2B), 32 (1B) — strictest across input/output dtypes.
    return max(max(8, 32 // jnp.dtype(d).itemsize) for d in dtypes)


def _row_tile(n_rows: int, row_bytes: int, sub_mult: int) -> int:
    """Rows per block: as many as fit in the per-buffer byte budget."""
    budget = max(1, _TILE_BYTES // max(1, row_bytes))
    if n_rows <= sub_mult:
        return n_rows                      # block == full row extent: always legal
    tn = min(budget, n_rows)
    if tn < sub_mult:
        return sub_mult                    # minimum sublane-aligned tile
    return (tn // sub_mult) * sub_mult     # partial last block is masked by Pallas


def _scale_kernel(x_ref, o_ref, *, val: float):
    # Cast to the promoted (torch-matching) dtype, then multiply by the
    # compile-time constant weight value.
    o_ref[...] = x_ref[...].astype(o_ref.dtype) * jnp.asarray(val, dtype=o_ref.dtype)


def _scale_2d(x2d: jax.Array, val: float, out_dtype) -> jax.Array:
    rows, width = x2d.shape
    sub_mult = _sublane_multiple(x2d.dtype, out_dtype)
    out_item = jnp.dtype(out_dtype).itemsize
    in_item = jnp.dtype(x2d.dtype).itemsize
    tn = _row_tile(rows, width * out_item, sub_mult)   # budget keyed to largest buffer

    return pl.pallas_call(
        functools.partial(_scale_kernel, val=float(val)),
        out_shape=jax.ShapeDtypeStruct((rows, width), out_dtype),
        grid=(pl.cdiv(rows, tn),),
        in_specs=[pl.BlockSpec((tn, width), lambda i: (i, 0))],
        out_specs=pl.BlockSpec((tn, width), lambda i: (i, 0)),
        cost_estimate=pl.CostEstimate(
            flops=rows * width,
            transcendentals=0,
            bytes_accessed=rows * width * (in_item + out_item),
        ),
        compiler_params=pltpu.CompilerParams(
            dimension_semantics=("parallel",),
            vmem_limit_bytes=_VMEM_LIMIT,
        ),
    )(x2d)


def _scale_array(h: jax.Array, val: float, out_dtype) -> jax.Array:
    """Scale one node-type feature array by `val`, promoted to `out_dtype`."""
    if h.size == 0:
        return h.astype(out_dtype)
    if h.size % _LANE == 0:
        # Free (metadata) reshape to a lane-dense (rows, 128) view.
        x2d = h.reshape(h.size // _LANE, _LANE)
    else:
        # Ragged case: keep the (flattened) feature dim as the full last dim.
        x2d = h.reshape(h.shape[0], -1)
    return _scale_2d(x2d, val, out_dtype).reshape(h.shape)


def constant_node_weighter(h_g: dict, val: float = 1.0, fast_zero: bool = False) -> dict:
    """Heterograph-style wrapper: h_g maps ntype -> (N, D) feature matrix.

    Mirrors the PyTorch forward: each node type with N > 0 gets
      'weight' : constant (N, 1) float32 column
      'h'      : h * weight  (dtype promoted exactly like torch)
    Zero-node types are passed through with only 'h'.
    """
    # TODO(synk): the DGL heterograph's in-place node-data mutation has no Pallas
    # equivalent; the graph is represented as a dict of per-ntype feature dicts.
    wval = float(val)
    out = {}
    for ntype, h in h_g.items():
        n = h.shape[0]
        if n == 0:
            out[ntype] = {"h": h}
            continue
        out_dtype = jnp.promote_types(h.dtype, jnp.float32)  # torch promotion of h * f32 weight
        if wval == 1.0 and out_dtype == h.dtype:
            h_out = h                                         # bit-exact identity, skip the sweep
        elif wval == 0.0 and fast_zero:
            # Optional write-only fast path (halves HBM traffic). Changes 0*NaN/Inf
            # propagation vs. the reference, hence gated behind a flag.
            h_out = jnp.zeros(h.shape, dtype=out_dtype)
        else:
            h_out = _scale_array(h, wval, out_dtype)
        out[ntype] = {
            "h": h_out,
            # Constant (N, 1) weight column built in the wrapper: pure fill (no HBM
            # read); a lane-width-1 kernel output would only emit masked vst.msk.
            "weight": jnp.full((n, 1), wval, dtype=jnp.float32),
        }
    return out


if __name__ == "__main__":
    key = jax.random.PRNGKey(0)
    k1, k2, k3 = jax.random.split(key, 3)

    # Small heterograph exercising every code path:
    h_g = {
        "user": jax.random.normal(k1, (16, 32), dtype=jnp.float32),                       # lane-dense path
        "item": jax.random.normal(k2, (13, 40), dtype=jnp.float32),                       # ragged rows, partial block
        "movie": jax.random.normal(k3, (8, 32), dtype=jnp.float32).astype(jnp.bfloat16),  # bf16 -> f32 promotion
        "count": jnp.arange(9 * 7, dtype=jnp.int32).reshape(9, 7),                        # int32 -> f32 promotion
        "tag": jnp.zeros((0, 32), dtype=jnp.float32),                                     # zero nodes: untouched
    }

    ok = True
    for VAL in (0.5, 1.0):  # 0.5 exercises the kernel; 1.0 exercises the identity path
        result = constant_node_weighter(h_g, val=VAL)
        jax.block_until_ready(jax.tree_util.tree_leaves(result))

        for ntype, h in h_g.items():
            n = h.shape[0]
            if n > 0:
                ref_w = jnp.full((n, 1), VAL, dtype=jnp.float32)
                ref_h = h * ref_w                      # JAX promotion matches torch promotion
                got = result[ntype]
                ok &= "weight" in got
                ok &= bool(got["h"].dtype == ref_h.dtype)
                ok &= bool(jnp.allclose(got["h"].astype(jnp.float32),
                                        ref_h.astype(jnp.float32),
                                        atol=1e-5, rtol=1e-5))
                ok &= bool(jnp.allclose(got["weight"], ref_w))
            else:
                ok &= result[ntype]["h"].shape == h.shape
                ok &= "weight" not in result[ntype]

    print("KERNEL_OK" if ok else "MISMATCH")
</pallas_src>

<mosaic_0001>
module attributes {stable_mosaic.version = 11 : i64} {
  func.func @_scale_kernel(%arg0: i32, %arg1: memref<4x128xf32, #tpu.memory_space<vmem>>, %arg2: memref<4x128xf32, #tpu.memory_space<vmem>>) attributes {dimension_semantics = [#tpu.dimension_semantics<parallel>], iteration_bounds = array<i64: 1>, scalar_prefetch = 0 : i64, scratch_operands = 0 : i64, tpu.core_type = #tpu.core_type<tc>, window_params = [{transform_indices = @transform_0, window_bounds = array<i64: 4, 128>}, {transform_indices = @transform_1, window_bounds = array<i64: 4, 128>}]} {
    %c0 = arith.constant 0 : index
    %c0_0 = arith.constant 0 : index
    %0 = vector.load %arg1[%c0, %c0_0] : memref<4x128xf32, #tpu.memory_space<vmem>>, vector<4x128xf32>
    %cst = arith.constant 5.000000e-01 : f32
    %1 = vector.broadcast %cst : f32 to vector<4x128xf32>
    %2 = arith.mulf %0, %1 : vector<4x128xf32>
    %c0_1 = arith.constant 0 : index
    %c0_2 = arith.constant 0 : index
    %3 = vector.load %arg2[%c0_1, %c0_2] : memref<4x128xf32, #tpu.memory_space<vmem>>, vector<4x128xf32>
    tpu.vector_store %arg2[%c0_1, %c0_2], %2 {strides = array<i32>} : memref<4x128xf32, #tpu.memory_space<vmem>>, vector<4x128xf32>,
    return
  }
  func.func @transform_0(%arg0: i32) -> (i32, i32) {
    %c0_i32 = arith.constant 0 : i32
    %c0_i32_0 = arith.constant 0 : i32
    return %arg0, %c0_i32 : i32, i32
  }
  func.func @transform_1(%arg0: i32) -> (i32, i32) {
    %c0_i32 = arith.constant 0 : i32
    %c0_i32_0 = arith.constant 0 : i32
    return %arg0, %c0_i32 : i32, i32
  }
}

</mosaic_0001>

<bundles_post_ra>
// kernel: tpu_custom_call.1
= control target key start
LH: loop header
LB: loop body
LE: loop exit
PB: predicated region body
PF: predicated region fallthrough
CT: control target
= control target key end

     0   :  { %6 = vsyncpa [#allocation3], 0  ;;  %s125_s0 = inlined_call_operand.hbm [shape: f32[4,128], index: 0, kind: input, shape index: {}]   ;;  %s126_s1 = inlined_call_operand.hbm [shape: f32[4,128], index: 1, kind: output, shape index: {}]  }
   0x1   :  { %7 = vsyncpa [#allocation4], 0  ;;  %s89_s6 = smov [#allocation2]   ;;  %s41_s10 = scalar_lea.hbm %s125_s0, 64 }
   0x2   :  { %s14_s7 = sshll.u32 %s89_s6, 4  ;;  %p42_p0 = scmp.ne.s32.totalorder %s125_s0, %s41_s10  ;;  %s15_s7 = int_to_ptr.vmem [resolvable:$true] %s14_s7 }
   0x3   :  { %p45_p1 = scmp.lt.u32.totalorder %s41_s10, %s125_s0 }
   0x5   :  { %p47_p2 = pnand %p45_p1, %p42_p0 }
   0x7   :  { %50 = shalt.err (!%p47_p2)
}
   0x8   :  { %s51_s15 = scalar_lea.vmem %s15_s7, 64  ;;  %p56_p4 = scmp.lt.s32.totalorder %s15_s7, %s15_s7 }
   0x9   :  { %p52_p3 = scmp.ne.s32.totalorder %s15_s7, %s51_s15  ;;  %p57_p5 = scmp.lt.s32.totalorder %s51_s15, %s51_s15 }
   0xb   :  { %p58_p6 = por %p57_p5, %p56_p4 }
   0xd   :  { %p59_p7 = pnand %p58_p6, %p52_p3 }
   0xf   :  { %62 = shalt.err (!%p59_p7)
}
  0x10   :  { %17 = dma.hbm_to_vmem [thread:$0]  %s125_s0, 64, %s15_s7, [#allocation3]  }
  0x11   :  { %85 = dma.done.wait [#allocation3], 64  }
  0x12   :  { %86 = vsyncadd [#allocation3], 4294967232  ;;  %s90_s18 = smov [#allocation5]   ;;  %v21_v0 = vld [vmem:[#allocation2] sm:$0xf] }
  0x13   :  { %s30_s19 = sshll.u32 %s90_s18, 4  ;;  %v22_v1 = vmul.f32 0.5, %v21_v0  ;;  %s31_s19 = int_to_ptr.vmem [resolvable:$true] %s30_s19 }
  0x14   :  { %s63_s20 = scalar_lea.vmem %s31_s19, 64  ;;  %p68_p9 = scmp.lt.s32.totalorder %s31_s19, %s31_s19 }
  0x15   :  { %23 = vst [vmem:[#allocation5] sm:$0xf] %v22_v1  ;;  %p64_p8 = scmp.ne.s32.totalorder %s31_s19, %s63_s20  ;;  %p69_p10 = scmp.lt.s32.totalorder %s63_s20, %s63_s20 }
  0x17   :  { %p70_p11 = por %p69_p10, %p68_p9 }
  0x19   :  { %p71_p12 = pnand %p70_p11, %p64_p8 }
  0x1b   :  { %74 = shalt.err (!%p71_p12)
}
  0x1c   :  { %s75_s23 = scalar_lea.hbm %s126_s1, 64 }
  0x1d   :  { %p76_p13 = scmp.ne.s32.totalorder %s126_s1, %s75_s23  ;;  %p79_p0 = scmp.lt.u32.totalorder %s75_s23, %s126_s1 }
  0x1f   :  { %p81_p1 = pnand %p79_p0, %p76_p13 }
  0x21   :  { %84 = shalt.err (!%p81_p1)
}
  0x22   :  { %33 = dma.vmem_to_hbm [thread:$0]  %s31_s19, 64, %s126_s1, [#allocation4]  }
  0x23   :  { %87 = dma.done.wait [#allocation4], 64  }
  0x24   :  { %88 = vsyncadd [#allocation4], 4294967232 }
  0x25   :  { %37 = vsyncpa [#allocation3], 1 }
  0x26   :  { %38 = vsyncpa [#allocation4], 1 }

</bundles_post_ra>
